<compile_context>
chip_gen: v7x
topology: tpu7x:2x2x1
jax: 0.10.0
libtpu: 0.0.40
codegen_flags: <defaults>
</compile_context>

<pallas_src>
import functools

import jax
import jax.numpy as jnp
from jax import lax
from jax.experimental import pallas as pl
from jax.experimental.pallas import tpu as pltpu


LN_EPS = 1e-5  # nn.LayerNorm default eps


def _round_up(x, m):
    return (x + m - 1) // m * m


def _residual_block_kernel(x_ref, w_ref, b_ref, gamma_ref, beta_ref, o_ref,
                           acc_ref, *, d_out, d_out_pad):
    """Grid = (batch_tiles, k_tiles). K (reduction) is the last grid axis."""
    k = pl.program_id(1)

    @pl.when(k == 0)
    def _():
        acc_ref[...] = jnp.zeros_like(acc_ref)

    # Fused main+shortcut matmul: one MXU pass over this x block per K step.
    acc_ref[...] += jnp.dot(x_ref[...], w_ref[...],
                            preferred_element_type=jnp.float32)

    @pl.when(k == pl.num_programs(1) - 1)
    def _():
        acc = acc_ref[...] + b_ref[...]           # (tm, 2*d_out_pad), f32
        h = acc[:, :d_out_pad]                    # main branch, pre-LayerNorm
        sc = acc[:, d_out_pad:]                   # shortcut branch

        # Single-pass LayerNorm stats over the REAL d_out columns.  Padded
        # columns of h are exactly zero (zero weight cols + zero bias), so
        # scaling the sums by 1/d_out gives the exact mean / biased variance.
        inv_d = 1.0 / d_out
        mean = jnp.sum(h, axis=-1, keepdims=True) * inv_d           # E[x]
        mean_sq = jnp.sum(h * h, axis=-1, keepdims=True) * inv_d    # E[x^2]
        var = jnp.maximum(mean_sq - mean * mean, 0.0)               # biased var
        h_norm = (h - mean) * lax.rsqrt(var + LN_EPS)
        h_norm = h_norm * gamma_ref[...] + beta_ref[...]

        act = jnp.maximum(h_norm, 0.0)  # ReLU; Dropout == identity (eval mode)
        # TODO(synk): training-mode dropout via in-kernel pltpu PRNG per tile.

        o_ref[...] = (act + sc).astype(o_ref.dtype)


def residual_block(x, w1, b1, gamma, beta, ws=None, bs=None, *,
                   compute_dtype=jnp.bfloat16, tm_max=256, tk_max=512):
    """ResidualBlock forward.

    x:  (B, D_in) f32
    w1: (D_in, D_out) main-branch weight (transpose of nn.Linear.weight)
    b1, gamma, beta: (1, D_out)
    ws, bs: shortcut Linear params; pass None for the Identity shortcut
            (requires D_in == D_out).
    """
    B, D_in = x.shape
    D_out = w1.shape[1]

    if ws is None:  # nn.Identity shortcut
        assert D_in == D_out, "Identity shortcut requires input_dim == output_dim"
        ws = jnp.eye(D_in, dtype=jnp.float32)
        bs = jnp.zeros((1, D_out), dtype=jnp.float32)

    # Tile sizes (multiples of sublane/lane granularity).
    tm = min(tm_max, _round_up(B, 8))
    tk = min(tk_max, _round_up(D_in, 128))
    B_pad = _round_up(B, tm)
    K_pad = _round_up(D_in, tk)
    Dp = _round_up(D_out, 128)       # lane-dense output width
    Ncat = 2 * Dp                    # [main | shortcut] fused width

    f32 = jnp.float32
    x_p = jnp.zeros((B_pad, K_pad), f32).at[:B, :D_in].set(x).astype(compute_dtype)
    w1_p = jnp.zeros((K_pad, Dp), f32).at[:D_in, :D_out].set(w1)
    ws_p = jnp.zeros((K_pad, Dp), f32).at[:D_in, :D_out].set(ws)
    w_cat = jnp.concatenate([w1_p, ws_p], axis=1).astype(compute_dtype)
    b1_p = jnp.zeros((1, Dp), f32).at[:, :D_out].set(b1)
    bs_p = jnp.zeros((1, Dp), f32).at[:, :D_out].set(bs)
    b_cat = jnp.concatenate([b1_p, bs_p], axis=1)
    gamma_p = jnp.zeros((1, Dp), f32).at[:, :D_out].set(gamma)
    beta_p = jnp.zeros((1, Dp), f32).at[:, :D_out].set(beta)

    grid = (B_pad // tm, K_pad // tk)

    # VMEM budget: double-buffered input/output blocks + f32 accumulator.
    itm = jnp.dtype(compute_dtype).itemsize
    vmem_bytes = (2 * tm * tk * itm            # x blocks
                  + 2 * tk * Ncat * itm        # fused weight blocks
                  + 2 * (Ncat + 2 * Dp) * 4    # biases / gamma / beta
                  + 2 * tm * Dp * 4            # output blocks
                  + tm * Ncat * 4)             # accumulator scratch
    vmem_limit = min(max(2 * vmem_bytes + (4 << 20), 32 << 20), 64 << 20)

    kernel = functools.partial(_residual_block_kernel,
                               d_out=D_out, d_out_pad=Dp)

    out = pl.pallas_call(
        kernel,
        out_shape=jax.ShapeDtypeStruct((B_pad, Dp), jnp.float32),
        grid_spec=pltpu.PrefetchScalarGridSpec(
            num_scalar_prefetch=0,
            grid=grid,
            in_specs=[
                pl.BlockSpec((tm, tk), lambda i, k: (i, k)),      # x
                pl.BlockSpec((tk, Ncat), lambda i, k: (k, 0)),    # [w1 | ws]
                pl.BlockSpec((1, Ncat), lambda i, k: (0, 0)),     # [b1 | bs]
                pl.BlockSpec((1, Dp), lambda i, k: (0, 0)),       # gamma
                pl.BlockSpec((1, Dp), lambda i, k: (0, 0)),       # beta
            ],
            out_specs=pl.BlockSpec((tm, Dp), lambda i, k: (i, 0)),
            scratch_shapes=[pltpu.VMEM((tm, Ncat), jnp.float32)],
        ),
        compiler_params=pltpu.CompilerParams(
            dimension_semantics=("parallel", "arbitrary"),
            vmem_limit_bytes=vmem_limit,
        ),
    )(x_p, w_cat, b_cat, gamma_p, beta_p)

    return out[:B, :D_out]


def reference(x, w1, b1, gamma, beta, ws=None, bs=None):
    h = x @ w1 + b1
    mean = jnp.mean(h, axis=-1, keepdims=True)
    var = jnp.mean((h - mean) ** 2, axis=-1, keepdims=True)
    h = (h - mean) * lax.rsqrt(var + LN_EPS) * gamma + beta
    act = jnp.maximum(h, 0.0)
    shortcut = x if ws is None else (x @ ws + bs)
    return act + shortcut


if __name__ == "__main__":
    key = jax.random.PRNGKey(0)
    kx, kw1, kb1, kws, kbs, kx2, kw2, kb2 = jax.random.split(key, 8)

    # --- Case 1: input_dim != output_dim -> Linear shortcut -----------------
    B, D_in, D_out = 8, 32, 64
    x = jax.random.normal(kx, (B, D_in), dtype=jnp.float32)
    # PyTorch Linear weight is (out, in); we store the transpose (in, out).
    w1 = jax.random.normal(kw1, (D_in, D_out), dtype=jnp.float32) * (1.0 / jnp.sqrt(D_in))
    b1 = jax.random.normal(kb1, (1, D_out), dtype=jnp.float32) * 0.1
    gamma = jnp.ones((1, D_out), dtype=jnp.float32)
    beta = jnp.zeros((1, D_out), dtype=jnp.float32)
    ws = jax.random.normal(kws, (D_in, D_out), dtype=jnp.float32) * (1.0 / jnp.sqrt(D_in))
    bs = jax.random.normal(kbs, (1, D_out), dtype=jnp.float32) * 0.1

    ref1 = reference(x, w1, b1, gamma, beta, ws, bs)

    out_f32 = jax.block_until_ready(
        residual_block(x, w1, b1, gamma, beta, ws, bs, compute_dtype=jnp.float32))
    assert out_f32.shape == (B, D_out)
    assert jnp.allclose(out_f32, ref1, atol=1e-4, rtol=1e-4), "f32 mismatch (Linear shortcut)"

    out_bf16 = jax.block_until_ready(
        residual_block(x, w1, b1, gamma, beta, ws, bs, compute_dtype=jnp.bfloat16))
    assert out_bf16.shape == (B, D_out)
    assert jnp.allclose(out_bf16, ref1, atol=1e-1, rtol=1e-1), "bf16 mismatch (Linear shortcut)"

    # --- Case 2: input_dim == output_dim -> Identity shortcut ---------------
    D = 64
    x2 = jax.random.normal(kx2, (B, D), dtype=jnp.float32)
    w2 = jax.random.normal(kw2, (D, D), dtype=jnp.float32) * (1.0 / jnp.sqrt(D))
    b2 = jax.random.normal(kb2, (1, D), dtype=jnp.float32) * 0.1
    gamma2 = jnp.ones((1, D), dtype=jnp.float32)
    beta2 = jnp.zeros((1, D), dtype=jnp.float32)

    ref2 = reference(x2, w2, b2, gamma2, beta2)
    out2 = jax.block_until_ready(
        residual_block(x2, w2, b2, gamma2, beta2, compute_dtype=jnp.float32))
    assert out2.shape == (B, D)
    assert jnp.allclose(out2, ref2, atol=1e-4, rtol=1e-4), "f32 mismatch (Identity shortcut)"

    print("KERNEL_OK")
</pallas_src>

<mosaic_0001>
module attributes {stable_mosaic.version = 11 : i64} {
  func.func @_residual_block_kernel(%arg0: i32, %arg1: i32, %arg2: memref<8x128xf32, #tpu.memory_space<vmem>>, %arg3: memref<128x256xf32, #tpu.memory_space<vmem>>, %arg4: memref<1x256xf32, #tpu.memory_space<vmem>>, %arg5: memref<1x128xf32, #tpu.memory_space<vmem>>, %arg6: memref<1x128xf32, #tpu.memory_space<vmem>>, %arg7: memref<8x128xf32, #tpu.memory_space<vmem>>, %arg8: memref<8x256xf32, #tpu.memory_space<vmem>>) attributes {dimension_semantics = [#tpu.dimension_semantics<parallel>, #tpu.dimension_semantics<arbitrary>], iteration_bounds = array<i64: 1, 1>, scalar_prefetch = 0 : i64, scratch_operands = 1 : i64, tpu.core_type = #tpu.core_type<tc>, window_params = [{transform_indices = @transform_0, window_bounds = array<i64: 8, 128>}, {transform_indices = @transform_1, window_bounds = array<i64: 128, 256>}, {pipeline_mode = #tpu.pipeline_mode<synchronous>, transform_indices = @transform_2, window_bounds = array<i64: 1, 256>}, {pipeline_mode = #tpu.pipeline_mode<synchronous>, transform_indices = @transform_3, window_bounds = array<i64: 1, 128>}, {pipeline_mode = #tpu.pipeline_mode<synchronous>, transform_indices = @transform_4, window_bounds = array<i64: 1, 128>}, {transform_indices = @transform_5, window_bounds = array<i64: 8, 128>}]} {
    %c0_i32 = arith.constant 0 : i32
    %0 = arith.cmpi eq, %arg1, %c0_i32 : i32
    %1 = arith.extui %0 : i1 to i32
    %c0_i32_0 = arith.constant 0 : i32
    %2 = arith.cmpi ne, %1, %c0_i32_0 : i32
    scf.if %2 {
      %cst_10 = arith.constant 0.000000e+00 : f32
      %12 = vector.broadcast %cst_10 : f32 to vector<8x256xf32>
      %c0_11 = arith.constant 0 : index
      %c0_12 = arith.constant 0 : index
      %13 = vector.load %arg8[%c0_11, %c0_12] : memref<8x256xf32, #tpu.memory_space<vmem>>, vector<8x256xf32>
      tpu.vector_store %arg8[%c0_11, %c0_12], %12 {strides = array<i32>} : memref<8x256xf32, #tpu.memory_space<vmem>>, vector<8x256xf32>,
    } else {
    }
    %c0 = arith.constant 0 : index
    %c0_1 = arith.constant 0 : index
    %3 = vector.load %arg8[%c0, %c0_1] : memref<8x256xf32, #tpu.memory_space<vmem>>, vector<8x256xf32>
    %c0_2 = arith.constant 0 : index
    %c0_3 = arith.constant 0 : index
    %4 = vector.load %arg2[%c0_2, %c0_3] : memref<8x128xf32, #tpu.memory_space<vmem>>, vector<8x128xf32>
    %c0_4 = arith.constant 0 : index
    %c0_5 = arith.constant 0 : index
    %5 = vector.load %arg3[%c0_4, %c0_5] : memref<128x256xf32, #tpu.memory_space<vmem>>, vector<128x256xf32>
    %cst = arith.constant dense<0.000000e+00> : vector<8x256xf32>
    %6 = tpu.matmul %4, %5, %cst {dimension_numbers = #tpu.dot_dimension_numbers<[1], [0], [0], [1], [0, 0, 1, 1], [], []>} : vector<8x128xf32>, vector<128x256xf32>, vector<8x256xf32> -> vector<8x256xf32>
    %7 = arith.addf %3, %6 : vector<8x256xf32>
    %c0_6 = arith.constant 0 : index
    %c0_7 = arith.constant 0 : index
    %8 = vector.load %arg8[%c0_6, %c0_7] : memref<8x256xf32, #tpu.memory_space<vmem>>, vector<8x256xf32>
    tpu.vector_store %arg8[%c0_6, %c0_7], %7 {strides = array<i32>} : memref<8x256xf32, #tpu.memory_space<vmem>>, vector<8x256xf32>,
    %c0_i32_8 = arith.constant 0 : i32
    %9 = arith.cmpi eq, %arg1, %c0_i32_8 : i32
    %10 = arith.extui %9 : i1 to i32
    %c0_i32_9 = arith.constant 0 : i32
    %11 = arith.cmpi ne, %10, %c0_i32_9 : i32
    scf.if %11 {
      %c0_10 = arith.constant 0 : index
      %c0_11 = arith.constant 0 : index
      %12 = vector.load %arg8[%c0_10, %c0_11] : memref<8x256xf32, #tpu.memory_space<vmem>>, vector<8x256xf32>
      %c0_12 = arith.constant 0 : index
      %c0_13 = arith.constant 0 : index
      %13 = vector.load %arg4[%c0_12, %c0_13] : memref<1x256xf32, #tpu.memory_space<vmem>>, vector<1x256xf32>
      %14 = vector.broadcast %13 : vector<1x256xf32> to vector<8x256xf32>
      %15 = arith.addf %12, %14 : vector<8x256xf32>
      %16 = vector.extract_strided_slice %15 {offsets = [0, 0], sizes = [8, 128], strides = [1, 1]} : vector<8x256xf32> to vector<8x128xf32>
      %17 = vector.extract_strided_slice %15 {offsets = [0, 128], sizes = [8, 128], strides = [1, 1]} : vector<8x256xf32> to vector<8x128xf32>
      %cst_14 = arith.constant dense<0.000000e+00> : vector<8xf32>
      %18 = vector.multi_reduction <add>, %16, %cst_14 [1] : vector<8x128xf32> to vector<8xf32>
      %19 = vector.shape_cast %18 : vector<8xf32> to vector<8x1xf32>
      %cst_15 = arith.constant 1.562500e-02 : f32
      %20 = vector.broadcast %cst_15 : f32 to vector<8x1xf32>
      %21 = arith.mulf %19, %20 : vector<8x1xf32>
      %22 = arith.mulf %16, %16 : vector<8x128xf32>
      %cst_16 = arith.constant dense<0.000000e+00> : vector<8xf32>
      %23 = vector.multi_reduction <add>, %22, %cst_16 [1] : vector<8x128xf32> to vector<8xf32>
      %24 = vector.shape_cast %23 : vector<8xf32> to vector<8x1xf32>
      %cst_17 = arith.constant 1.562500e-02 : f32
      %25 = vector.broadcast %cst_17 : f32 to vector<8x1xf32>
      %26 = arith.mulf %24, %25 : vector<8x1xf32>
      %27 = arith.mulf %21, %21 : vector<8x1xf32>
      %28 = arith.subf %26, %27 : vector<8x1xf32>
      %cst_18 = arith.constant 0.000000e+00 : f32
      %29 = vector.broadcast %cst_18 : f32 to vector<8x1xf32>
      %30 = arith.maximumf %28, %29 : vector<8x1xf32>
      %31 = vector.broadcast %21 : vector<8x1xf32> to vector<8x128xf32>
      %32 = arith.subf %16, %31 : vector<8x128xf32>
      %cst_19 = arith.constant 9.99999974E-6 : f32
      %33 = vector.broadcast %cst_19 : f32 to vector<8x1xf32>
      %34 = arith.addf %30, %33 : vector<8x1xf32>
      %35 = math.rsqrt %34 : vector<8x1xf32>
      %36 = vector.broadcast %35 : vector<8x1xf32> to vector<8x128xf32>
      %37 = arith.mulf %32, %36 : vector<8x128xf32>
      %c0_20 = arith.constant 0 : index
      %c0_21 = arith.constant 0 : index
      %38 = vector.load %arg5[%c0_20, %c0_21] : memref<1x128xf32, #tpu.memory_space<vmem>>, vector<1x128xf32>
      %39 = vector.broadcast %38 : vector<1x128xf32> to vector<8x128xf32>
      %40 = arith.mulf %37, %39 : vector<8x128xf32>
      %c0_22 = arith.constant 0 : index
      %c0_23 = arith.constant 0 : index
      %41 = vector.load %arg6[%c0_22, %c0_23] : memref<1x128xf32, #tpu.memory_space<vmem>>, vector<1x128xf32>
      %42 = vector.broadcast %41 : vector<1x128xf32> to vector<8x128xf32>
      %43 = arith.addf %40, %42 : vector<8x128xf32>
      %cst_24 = arith.constant 0.000000e+00 : f32
      %44 = vector.broadcast %cst_24 : f32 to vector<8x128xf32>
      %45 = arith.maximumf %43, %44 : vector<8x128xf32>
      %46 = arith.addf %45, %17 : vector<8x128xf32>
      %c0_25 = arith.constant 0 : index
      %c0_26 = arith.constant 0 : index
      %47 = vector.load %arg7[%c0_25, %c0_26] : memref<8x128xf32, #tpu.memory_space<vmem>>, vector<8x128xf32>
      tpu.vector_store %arg7[%c0_25, %c0_26], %46 {strides = array<i32>} : memref<8x128xf32, #tpu.memory_space<vmem>>, vector<8x128xf32>,
    } else {
    }
    return
  }
  func.func @transform_0(%arg0: i32, %arg1: i32) -> (i32, i32) {
    %c0_i32 = arith.constant 0 : i32
    return %arg0, %arg1 : i32, i32
  }
  func.func @transform_1(%arg0: i32, %arg1: i32) -> (i32, i32) {
    %c0_i32 = arith.constant 0 : i32
    %c0_i32_0 = arith.constant 0 : i32
    return %arg1, %c0_i32 : i32, i32
  }
  func.func @transform_2(%arg0: i32, %arg1: i32) -> (i32, i32) {
    %c0_i32 = arith.constant 0 : i32
    %c0_i32_0 = arith.constant 0 : i32
    %c0_i32_1 = arith.constant 0 : i32
    return %c0_i32, %c0_i32_0 : i32, i32
  }
  func.func @transform_3(%arg0: i32, %arg1: i32) -> (i32, i32) {
    %c0_i32 = arith.constant 0 : i32
    %c0_i32_0 = arith.constant 0 : i32
    %c0_i32_1 = arith.constant 0 : i32
    return %c0_i32, %c0_i32_0 : i32, i32
  }
  func.func @transform_4(%arg0: i32, %arg1: i32) -> (i32, i32) {
    %c0_i32 = arith.constant 0 : i32
    %c0_i32_0 = arith.constant 0 : i32
    %c0_i32_1 = arith.constant 0 : i32
    return %c0_i32, %c0_i32_0 : i32, i32
  }
  func.func @transform_5(%arg0: i32, %arg1: i32) -> (i32, i32) {
    %c0_i32 = arith.constant 0 : i32
    %c0_i32_0 = arith.constant 0 : i32
    return %arg0, %c0_i32 : i32, i32
  }
}

</mosaic_0001>

<bundles_post_ra>
// kernel: tpu_custom_call.1
= control target key start
LH: loop header
LB: loop body
LE: loop exit
PB: predicated region body
PF: predicated region fallthrough
CT: control target
= control target key end

     0   :  { %10 = vsyncpa [#allocation4], 0  ;;  %s433_s0 = inlined_call_operand.hbm [shape: f32[8,128], index: 0, kind: input, shape index: {}]   ;;  %s434_s1 = inlined_call_operand.hbm [shape: f32[128,256], index: 1, kind: input, shape index: {}]   ;;  %s435_s2 = inlined_call_operand.vmem [shape: f32[1,256], index: 2, kind: input, shape index: {}]   ;;  %s436_s3 = inlined_call_operand.vmem [shape: f32[1,128], index: 3, kind: input, shape index: {}]   ;;  %s437_s4 = inlined_call_operand.vmem [shape: f32[1,128], index: 4, kind: input, shape index: {}]   ;;  %s438_s5 = inlined_call_operand.hbm [shape: f32[8,128], index: 5, kind: output, shape index: {}]  }
   0x1   :  { %11 = vsyncpa [#allocation7], 0 }
   0x2   :  { %12 = vsyncpa [#allocation5], 0  ;;  %s345_s18 = smov [#allocation3]   ;;  %s346_s20 = smov [#allocation6]  }
   0x3   :  { %s19_s19 = sshll.u32 %s345_s18, 4  ;;  %s28_s21 = sshll.u32 %s346_s20, 4  ;;  %s20_s19 = int_to_ptr.vmem [resolvable:$true] %s19_s19  ;;  %s381_s21 = int_to_ptr.vmem [resolvable:$true] %s28_s21 }
   0x4   :  { %s273_s24 = scalar_lea.hbm %s433_s0, 128 }
   0x5   :  { %p274_p0 = scmp.ne.s32.totalorder %s433_s0, %s273_s24  ;;  %p277_p1 = scmp.lt.u32.totalorder %s273_s24, %s433_s0 }
   0x7   :  { %p279_p2 = pnand %p277_p1, %p274_p0 }
   0x9   :  { %282 = shalt.err (!%p279_p2)
}
   0xa   :  { %s283_s29 = scalar_lea.vmem %s20_s19, 128  ;;  %p288_p4 = scmp.lt.s32.totalorder %s20_s19, %s20_s19 }
   0xb   :  { %p284_p3 = scmp.ne.s32.totalorder %s20_s19, %s283_s29  ;;  %p289_p5 = scmp.lt.s32.totalorder %s283_s29, %s283_s29 }
   0xd   :  { %p290_p6 = por %p289_p5, %p288_p4 }
   0xf   :  { %p291_p7 = pnand %p290_p6, %p284_p3 }
  0x11   :  { %294 = shalt.err (!%p291_p7)
}
  0x12   :  { %22 = dma.hbm_to_vmem [thread:$0]  %s433_s0, 128, %s20_s19, [#allocation4]  }
  0x13   :  { %s295_s9 = scalar_lea.hbm %s434_s1, 4096 }
  0x14   :  { %p296_p8 = scmp.ne.s32.totalorder %s434_s1, %s295_s9  ;;  %p299_p9 = scmp.lt.u32.totalorder %s295_s9, %s434_s1 }
  0x16   :  { %p301_p10 = pnand %p299_p9, %p296_p8 }
  0x18   :  { %304 = shalt.err (!%p301_p10)
}
  0x19   :  { %s305_s14 = scalar_lea.vmem %s381_s21, 4096  ;;  %p310_p12 = scmp.lt.s32.totalorder %s381_s21, %s381_s21 }
  0x1a   :  { %p306_p11 = scmp.ne.s32.totalorder %s381_s21, %s305_s14  ;;  %p311_p13 = scmp.lt.s32.totalorder %s305_s14, %s305_s14 }
  0x1c   :  { %p312_p0 = por %p311_p13, %p310_p12 }
  0x1e   :  { %p313_p1 = pnand %p312_p0, %p306_p11 }
  0x20   :  { %316 = shalt.err (!%p313_p1)
}
  0x21   :  { %s347_s0 = smov 256   ;;  %s348_s15 = smov 16  }
  0x22   :  { %34 = dma.hbm_to_vmem [thread:$0]  %s434_s1, 4096, %s381_s21, [#allocation7], %s347_s0, %s347_s0, %s348_s15  }
  0x23   :  { %339 = dma.done.wait [#allocation4], 128  }
  0x24   :  { %340 = vsyncadd [#allocation4], 4294967168 }
  0x25   :  { %341 = dma.done.wait [#allocation7], 4096  }
  0x26   :  { %342 = vsyncadd [#allocation7], 4294963200  ;;  %v349_v0 = vmov 0.0   ;;  %v57_v1 = vld [vmem:[#allocation6 + $0x8] sm:$0xff]  ;;  %v59_v2 = vld [vmem:[#allocation6 + $0x18] sm:$0xff]  ;;  %v170_v50 = vlaneseq  ;;  %s350_s22 = smov [#allocation8]  }
  0x27   :  { %152 = vmatprep.mubr.f32.mxu0 %v349_v0  ;;  %v56_v3 = vld [vmem:[#allocation6] sm:$0xff]  ;;  %v233_v4 = vpack.c.bf16 %v59_v2, %v57_v1  ;;  %v58_v5 = vld [vmem:[#allocation6 + $0x10] sm:$0xff]  ;;  %v61_v6 = vld [vmem:[#allocation6 + $0x28] sm:$0xff]  ;;  %s221_s23 = sshll.u32 %s350_s22, 4  ;;  %s222_s23 = int_to_ptr.vmem [resolvable:$true] %s221_s23 }
  0x28   :  { %v63_v7 = vld [vmem:[#allocation6 + $0x38] sm:$0xff]  ;;  %v235_v8 = vpack.c.bf16 %v58_v5, %v56_v3  ;;  %v60_v10 = vld [vmem:[#allocation6 + $0x20] sm:$0xff]  ;;  %v62_v11 = vld [vmem:[#allocation6 + $0x30] sm:$0xff]  ;;  %v171_v51 = vshrl.u32 %v170_v50, 7  ;;  %s317_s24 = scalar_lea.vmem %s222_s23, 128  ;;  %p322_p3 = scmp.lt.s32.totalorder %s222_s23, %s222_s23 }
  0x29   :  { %v237_v9 = vpack.c.bf16 %v63_v7, %v61_v6  ;;  %v65_v12 = vld [vmem:[#allocation6 + $0x48] sm:$0xff]  ;;  %234 = vmatprep.subr.bf16.mxu0 %v233_v4  ;;  %v67_v13 = vld [vmem:[#allocation6 + $0x58] sm:$0xff]  ;;  %v239_v14 = vpack.c.bf16 %v62_v11, %v60_v10  ;;  %v64_v16 = vld [vmem:[#allocation6 + $0x40] sm:$0xff]  ;;  %p318_p2 = scmp.ne.s32.totalorder %s222_s23, %s317_s24  ;;  %p323_p4 = scmp.lt.s32.totalorder %s317_s24, %s317_s24 }
  0x2a   :  { %236 = vmatpush1.bf16.msra.mxu0 %v235_v8  ;;  %v241_v15 = vpack.c.bf16 %v67_v13, %v65_v12  ;;  %v66_v17 = vld [vmem:[#allocation6 + $0x50] sm:$0xff]  ;;  %v69_v18 = vld [vmem:[#allocation6 + $0x68] sm:$0xff]  ;;  %v71_v19 = vld [vmem:[#allocation6 + $0x78] sm:$0xff]  ;;  %v176_v53 = vsub.s32 1, %v171_v51  ;;  %v172_v55 = vsub.s32 0, %v171_v51 }
  0x2b   :  { %238 = vmatprep.subr.bf16.mxu0 %v237_v9  ;;  %v243_v20 = vpack.c.bf16 %v66_v17, %v64_v16  ;;  %v245_v21 = vpack.c.bf16 %v71_v19, %v69_v18  ;;  %v68_v22 = vld [vmem:[#allocation6 + $0x60] sm:$0xff]  ;;  %v70_v23 = vld [vmem:[#allocation6 + $0x70] sm:$0xff]  ;;  %v73_v24 = vld [vmem:[#allocation6 + $0x88] sm:$0xff]  ;;  %p324_p5 = por %p323_p4, %p322_p3 }
  0x2c   :  { %v75_v25 = vld [vmem:[#allocation6 + $0x98] sm:$0xff]  ;;  %v247_v26 = vpack.c.bf16 %v70_v23, %v68_v22  ;;  %v72_v28 = vld [vmem:[#allocation6 + $0x80] sm:$0xff]  ;;  %v74_v29 = vld [vmem:[#allocation6 + $0x90] sm:$0xff] }
  0x2d   :  { %v249_v27 = vpack.c.bf16 %v75_v25, %v73_v24  ;;  %v77_v30 = vld [vmem:[#allocation6 + $0xa8] sm:$0xff]  ;;  %v79_v31 = vld [vmem:[#allocation6 + $0xb8] sm:$0xff]  ;;  %v251_v32 = vpack.c.bf16 %v74_v29, %v72_v28  ;;  %v76_v34 = vld [vmem:[#allocation6 + $0xa0] sm:$0xff]  ;;  %p325_p6 = pnand %p324_p5, %p318_p2 }
  0x2e   :  { %240 = vmatpush1.bf16.msra.mxu0 %v239_v14  ;;  %v253_v33 = vpack.c.bf16 %v79_v31, %v77_v30  ;;  %v78_v35 = vld [vmem:[#allocation6 + $0xb0] sm:$0xff]  ;;  %v81_v36 = vld [vmem:[#allocation6 + $0xc8] sm:$0xff]  ;;  %v83_v37 = vld [vmem:[#allocation6 + $0xd8] sm:$0xff] }
  0x2f   :  { %242 = vmatprep.subr.bf16.mxu0 %v241_v15  ;;  %v255_v38 = vpack.c.bf16 %v78_v35, %v76_v34  ;;  %v257_v39 = vpack.c.bf16 %v83_v37, %v81_v36  ;;  %v80_v40 = vld [vmem:[#allocation6 + $0xc0] sm:$0xff]  ;;  %v82_v41 = vld [vmem:[#allocation6 + $0xd0] sm:$0xff]  ;;  %v85_v42 = vld [vmem:[#allocation6 + $0xe8] sm:$0xff] }
  0x30   :  { %v87_v43 = vld [vmem:[#allocation6 + $0xf8] sm:$0xff]  ;;  %v259_v44 = vpack.c.bf16 %v82_v41, %v80_v40  ;;  %v84_v46 = vld [vmem:[#allocation6 + $0xe0] sm:$0xff]  ;;  %v86_v47 = vld [vmem:[#allocation6 + $0xf0] sm:$0xff] }
  0x31   :  { %v261_v45 = vpack.c.bf16 %v87_v43, %v85_v42  ;;  %v263_v48 = vpack.c.bf16 %v86_v47, %v84_v46  ;;  %v55_v49 = vld [vmem:[#allocation3] sm:$0xff] }
  0x32   :  { %244 = vmatpush1.bf16.msra.mxu0 %v243_v20  ;;  %v168_v52 = vld [vmem:[%s435_s2] sm:$0x3] }
  0x33   :  { %246 = vmatprep.subr.bf16.mxu0 %v245_v21  ;;  %v177_v54 = vrot.slane %v168_v52, %v176_v53  ;;  %v173_v56 = vrot.slane %v168_v52, %v172_v55  ;;  %v231_v8 = vld [vmem:[%s436_s3] ss:$0 sm:$0xff] }
  0x34   :  { %v232_v10 = vld [vmem:[%s437_s4] ss:$0 sm:$0xff] }
  0x36   :  { %248 = vmatpush1.bf16.msra.mxu0 %v247_v26 }
  0x37   :  { %250 = vmatprep.subr.bf16.mxu0 %v249_v27 }
  0x3a   :  { %252 = vmatpush1.bf16.msra.mxu0 %v251_v32 }
  0x3b   :  { %254 = vmatprep.subr.bf16.mxu0 %v253_v33 }
  0x3e   :  { %256 = vmatpush1.bf16.msra.mxu0 %v255_v38 }
  0x3f   :  { %258 = vmatprep.subr.bf16.mxu0 %v257_v39 }
  0x42   :  { %260 = vmatpush1.bf16.msra.mxu0 %v259_v44 }
  0x43   :  { %262 = vmatprep.subr.bf16.mxu0 %v261_v45 }
  0x46   :  { %264 = vmatpush1.bf16.msra.mxu0 %v263_v48 }
  0x49   :  { %153 = vmatmul.mubr.f32.vlgmr.msra.gmra.mrb[0].mxu0 %v55_v49 }
 0x11c   :  { %v154_v57 = vpop.f32.mrb[0].mxu0 }
 0x11d   :  { %v180_v58 = vadd.f32 %v173_v56, %v154_v57  ;;  %v156_v59 = vpop.f32.mrb[1].mxu0 }
 0x11e   :  { %v181_v60 = vadd.f32 %v177_v54, %v156_v59 }
 0x11f   :  { %182 = vadd.xlane.f32.xlu0 %v180_v58  ;;  %v185_v61 = vmul.f32 %v180_v58, %v180_v58 }
 0x123   :  { %186 = vadd.xlane.f32.xlu0 %v185_v61 }
 0x1ac   :  { %v183_v62 = vpop.xlane.xlu0 %182 }
 0x1ad   :  { %v184_v63 = vmul.f32 0.015625, %v183_v62 }
 0x1af   :  { %v189_v1 = vmul.f32 %v184_v63, %v184_v63  ;;  %v192_v6 = vsub.f32 %v180_v58, %v184_v63 }
 0x1b0   :  { %v187_v0 = vpop.xlane.xlu0 %186 }
 0x1b1   :  { %v188_v2 = vmul.f32 0.015625, %v187_v0 }
 0x1b3   :  { %v190_v3 = vsub.f32 %v188_v2, %v189_v1 }
 0x1b5   :  { %v191_v4 = vmax.f32 %v190_v3, 0.0 }
 0x1b7   :  { %v193_v5 = vadd.f32 1e-05, %v191_v4 }
 0x1b9   :  { %271 = vrsqrt.f32 %v193_v5 }
 0x1c3   :  { %v272_v7 = vpop.eup %271 }
 0x1c4   :  { %v195_v9 = vmul.f32 %v272_v7, %v192_v6 }
 0x1c6   :  { %v203_v11 = vmul.f32 %v231_v8, %v195_v9 }
 0x1c8   :  { %v211_v12 = vadd.f32 %v232_v10, %v203_v11 }
 0x1ca   :  { %v212_v13 = vmax.f32 %v211_v12, 0.0 }
 0x1cc   :  { %v213_v14 = vadd.f32 %v212_v13, %v181_v60 }
 0x1ce   :  { %214 = vst [vmem:[#allocation8] sm:$0xff] %v213_v14 }
 0x1cf   :  { %328 = shalt.err (!%p325_p6)
}
 0x1d0   :  { %s329_s26 = scalar_lea.hbm %s438_s5, 128 }
 0x1d1   :  { %p330_p7 = scmp.ne.s32.totalorder %s438_s5, %s329_s26  ;;  %p333_p8 = scmp.lt.u32.totalorder %s329_s26, %s438_s5 }
 0x1d3   :  { %p335_p9 = pnand %p333_p8, %p330_p7 }
 0x1d5   :  { %338 = shalt.err (!%p335_p9)
}
 0x1d6   :  { %224 = dma.vmem_to_hbm [thread:$0]  %s222_s23, 128, %s438_s5, [#allocation5]  }
 0x1d7   :  { %343 = dma.done.wait [#allocation5], 128  }
 0x1d8   :  { %344 = vsyncadd [#allocation5], 4294967168 }
 0x1d9   :  { %228 = vsyncpa [#allocation4], 1 }
 0x1da   :  { %229 = vsyncpa [#allocation7], 1 }
 0x1db   :  { %230 = vsyncpa [#allocation5], 1 }

</bundles_post_ra>
